<compile_context>
chip_gen: v7x
topology: tpu7x:2x2x1
jax: 0.10.0
libtpu: 0.0.40
codegen_flags: <defaults>
</compile_context>

<pallas_src>
import jax
import jax.numpy as jnp
from jax.experimental import pallas as pl
from jax.experimental.pallas import tpu as pltpu


def _round_up(x: int, m: int) -> int:
    return ((x + m - 1) // m) * m


def _vmem_capacity_bytes() -> int:
    try:
        return int(pltpu.get_tpu_info().vmem_capacity_bytes)
    except Exception:
        return 64 << 20  # conservative fallback (v7x per-TC physical VMEM)


def _largest_aligned_divisor(dim: int, cap: int, quantum: int) -> int:
    """Largest multiple of `quantum` that divides `dim` and is <= cap (>= quantum)."""
    best = quantum
    t = quantum
    limit = min(dim, cap)
    while t <= limit:
        if dim % t == 0:
            best = t
        t += quantum
    return best


# ----------------------------- kernels --------------------------------------

def _linear_kernel_f32_out(x_ref, w_ref, b_ref, o_ref):
    """f32 output: accumulate directly into the K-resident output block."""
    k = pl.program_id(2)

    @pl.when(k == 0)
    def _init():
        # Seed the accumulator with the bias -> no separate +bias pass later.
        o_ref[...] = jnp.broadcast_to(b_ref[...], o_ref.shape)

    o_ref[...] += jnp.dot(x_ref[...], w_ref[...],
                          preferred_element_type=jnp.float32)


def _linear_kernel_acc(x_ref, w_ref, b_ref, o_ref, acc_ref):
    """Non-f32 output: f32 VMEM scratch accumulator, cast on the last K step."""
    k = pl.program_id(2)

    @pl.when(k == 0)
    def _init():
        acc_ref[...] = jnp.broadcast_to(b_ref[...], acc_ref.shape)

    acc_ref[...] += jnp.dot(x_ref[...], w_ref[...],
                            preferred_element_type=jnp.float32)

    @pl.when(k == pl.num_programs(2) - 1)
    def _finalize():
        o_ref[...] = acc_ref[...].astype(o_ref.dtype)


# ----------------------------- wrapper ---------------------------------------

def prototype_model_forward(x, w, b, *, compute_dtype=jnp.bfloat16,
                            tm_cap=512, tn_cap=1024, tk_cap=1024):
    """Pallas equivalent of PrototypeModel.forward: logit_fc(X) = X @ W + b."""
    M, K = x.shape
    Kw, N = w.shape
    assert K == Kw, (K, Kw)
    assert b.shape == (N,), b.shape

    out_dtype = x.dtype
    compute_dtype = jnp.dtype(x.dtype if compute_dtype is None else compute_dtype)
    c_item = compute_dtype.itemsize
    o_item = jnp.dtype(out_dtype).itemsize

    # bf16 MXU operands; f32 bias for an exact one-time add.
    xc = x.astype(compute_dtype)
    wc = w.astype(compute_dtype)
    bc = b.astype(jnp.float32).reshape(1, N)

    # Only K needs zero-padding (reduction correctness).  M/N edges are handled
    # by partial blocks; their garbage rows/cols are never written back.
    Kp = _round_up(K, 128)
    if Kp != K:
        xc = jnp.pad(xc, ((0, 0), (0, Kp - K)))
        wc = jnp.pad(wc, ((0, Kp - K), (0, 0)))

    # ---- generation-aware tile selection ------------------------------------
    vmem_cap = _vmem_capacity_bytes()
    budget = max(16 << 20, int(vmem_cap * 0.45))  # leave room for double-buffers

    tk = _largest_aligned_divisor(Kp, tk_cap, 128)
    tm = M if M <= tm_cap else tm_cap   # full-dim, or multiple of 8/16
    tn = N if N <= tn_cap else tn_cap   # full-dim, or multiple of 128 (lane-dense)

    def _footprint(tm_, tn_, tk_):
        return (2 * (tm_ * tk_ + tk_ * tn_) * c_item   # double-buffered X, W
                + 2 * tn_ * 4                          # bias tiles
                + 2 * tm_ * tn_ * o_item               # output block (+ buffering)
                + tm_ * tn_ * 4)                       # worst-case f32 scratch

    # Shrink tk, then tn, if the double-buffered footprint would blow VMEM.
    while _footprint(tm, tn, tk) > budget and tk > 128:
        tk = _largest_aligned_divisor(Kp, tk // 2, 128)
    while _footprint(tm, tn, tk) > budget and tn > 256:
        tn = max(256, _round_up(tn // 2, 128))

    gm = pl.cdiv(M, tm)
    gn = pl.cdiv(N, tn)

    # v7x megacore: make sure both TensorCores get at least one output block.
    if gm * gn == 1 and N >= 256:
        tn = _round_up(pl.cdiv(N, 2), 128)
        gn = pl.cdiv(N, tn)

    grid = (gm, gn, Kp // tk)  # reduction axis last

    fp = _footprint(tm, tn, tk)
    vmem_limit = int(min(max(2 * fp + (4 << 20), 32 << 20), int(0.9 * vmem_cap)))

    cost = pl.CostEstimate(
        flops=2 * M * N * Kp,
        transcendentals=0,
        bytes_accessed=(M * Kp + Kp * N) * c_item + N * 4 + M * N * o_item,
    )

    in_specs = [
        pl.BlockSpec((tm, tk), lambda i, j, k: (i, k)),  # X tile
        pl.BlockSpec((tk, tn), lambda i, j, k: (k, j)),  # W tile
        pl.BlockSpec((1, tn), lambda i, j, k: (0, j)),   # bias tile
    ]
    out_spec = pl.BlockSpec((tm, tn), lambda i, j, k: (i, j))

    if out_dtype == jnp.float32:
        kernel, scratch = _linear_kernel_f32_out, []
    else:
        kernel, scratch = _linear_kernel_acc, [pltpu.VMEM((tm, tn), jnp.float32)]

    return pl.pallas_call(
        kernel,
        out_shape=jax.ShapeDtypeStruct((M, N), out_dtype),
        grid_spec=pltpu.PrefetchScalarGridSpec(
            num_scalar_prefetch=0,
            grid=grid,
            in_specs=in_specs,
            out_specs=out_spec,
            scratch_shapes=scratch,
        ),
        compiler_params=pltpu.CompilerParams(
            dimension_semantics=("parallel", "parallel", "arbitrary"),
            vmem_limit_bytes=vmem_limit,
        ),
        cost_estimate=cost,
    )(xc, wc, bc)


if __name__ == "__main__":
    # Small shapes consistent with nn.Linear(in_dim, out_dim) on [batch, in_dim].
    # in_dim=96 is deliberately not a 128-multiple to exercise the K-only padding path.
    # TODO(synk): at toy shapes a standalone kernel is overhead-dominated; in
    # production this linear would be fused into surrounding XLA/Pallas work.
    batch, in_dim, out_dim = 16, 96, 48

    key = jax.random.PRNGKey(0)
    kx, kw, kb = jax.random.split(key, 3)

    bound = 1.0 / (in_dim ** 0.5)
    x = jax.random.normal(kx, (batch, in_dim), dtype=jnp.float32)
    w = jax.random.uniform(kw, (in_dim, out_dim), dtype=jnp.float32,
                           minval=-bound, maxval=bound)
    b = jax.random.uniform(kb, (out_dim,), dtype=jnp.float32,
                           minval=-bound, maxval=bound)

    out = prototype_model_forward(x, w, b)
    out = jax.block_until_ready(out)

    ref = x @ w + b[None, :]
    assert out.shape == (batch, out_dim)
    assert out.dtype == x.dtype
    # bf16 MXU feed with f32 accumulation -> loose elementwise tolerance vs f32 ref.
    assert jnp.allclose(out, ref, atol=5e-2, rtol=5e-2), float(jnp.max(jnp.abs(out - ref)))

    print("KERNEL_OK")
</pallas_src>

<mosaic_0001>
module attributes {stable_mosaic.version = 11 : i64} {
  func.func @_linear_kernel_f32_out(%arg0: i32, %arg1: i32, %arg2: i32, %arg3: memref<16x128xbf16, #tpu.memory_space<vmem>>, %arg4: memref<128x48xbf16, #tpu.memory_space<vmem>>, %arg5: memref<1x48xf32, #tpu.memory_space<vmem>>, %arg6: memref<16x48xf32, #tpu.memory_space<vmem>>) attributes {dimension_semantics = [#tpu.dimension_semantics<parallel>, #tpu.dimension_semantics<parallel>, #tpu.dimension_semantics<arbitrary>], iteration_bounds = array<i64: 1, 1, 1>, scalar_prefetch = 0 : i64, scratch_operands = 0 : i64, tpu.core_type = #tpu.core_type<tc>, window_params = [{transform_indices = @transform_0, window_bounds = array<i64: 16, 128>}, {transform_indices = @transform_1, window_bounds = array<i64: 128, 48>}, {transform_indices = @transform_2, window_bounds = array<i64: 1, 48>}, {transform_indices = @transform_3, window_bounds = array<i64: 16, 48>}]} {
    %c0_i32 = arith.constant 0 : i32
    %0 = arith.cmpi eq, %arg2, %c0_i32 : i32
    %1 = arith.extui %0 : i1 to i32
    %c0_i32_0 = arith.constant 0 : i32
    %2 = arith.cmpi ne, %1, %c0_i32_0 : i32
    scf.if %2 {
      %c0_8 = arith.constant 0 : index
      %c0_9 = arith.constant 0 : index
      %9 = vector.load %arg5[%c0_8, %c0_9] : memref<1x48xf32, #tpu.memory_space<vmem>>, vector<1x48xf32>
      %10 = vector.shape_cast %9 : vector<1x48xf32> to vector<1x48xf32>
      %11 = vector.broadcast %10 : vector<1x48xf32> to vector<16x48xf32>
      %c0_10 = arith.constant 0 : index
      %c0_11 = arith.constant 0 : index
      %12 = vector.load %arg6[%c0_10, %c0_11] : memref<16x48xf32, #tpu.memory_space<vmem>>, vector<16x48xf32>
      tpu.vector_store %arg6[%c0_10, %c0_11], %11 {strides = array<i32>} : memref<16x48xf32, #tpu.memory_space<vmem>>, vector<16x48xf32>,
    } else {
    }
    %c0 = arith.constant 0 : index
    %c0_1 = arith.constant 0 : index
    %3 = vector.load %arg6[%c0, %c0_1] : memref<16x48xf32, #tpu.memory_space<vmem>>, vector<16x48xf32>
    %c0_2 = arith.constant 0 : index
    %c0_3 = arith.constant 0 : index
    %4 = vector.load %arg3[%c0_2, %c0_3] : memref<16x128xbf16, #tpu.memory_space<vmem>>, vector<16x128xbf16>
    %c0_4 = arith.constant 0 : index
    %c0_5 = arith.constant 0 : index
    %5 = vector.load %arg4[%c0_4, %c0_5] : memref<128x48xbf16, #tpu.memory_space<vmem>>, vector<128x48xbf16>
    %cst = arith.constant dense<0.000000e+00> : vector<16x48xf32>
    %6 = tpu.matmul %4, %5, %cst {dimension_numbers = #tpu.dot_dimension_numbers<[1], [0], [0], [1], [0, 0, 1, 1], [], []>} : vector<16x128xbf16>, vector<128x48xbf16>, vector<16x48xf32> -> vector<16x48xf32>
    %7 = arith.addf %3, %6 : vector<16x48xf32>
    %c0_6 = arith.constant 0 : index
    %c0_7 = arith.constant 0 : index
    %8 = vector.load %arg6[%c0_6, %c0_7] : memref<16x48xf32, #tpu.memory_space<vmem>>, vector<16x48xf32>
    tpu.vector_store %arg6[%c0_6, %c0_7], %7 {strides = array<i32>} : memref<16x48xf32, #tpu.memory_space<vmem>>, vector<16x48xf32>,
    return
  }
  func.func @transform_0(%arg0: i32, %arg1: i32, %arg2: i32) -> (i32, i32) {
    %c0_i32 = arith.constant 0 : i32
    return %arg0, %arg2 : i32, i32
  }
  func.func @transform_1(%arg0: i32, %arg1: i32, %arg2: i32) -> (i32, i32) {
    %c0_i32 = arith.constant 0 : i32
    return %arg2, %arg1 : i32, i32
  }
  func.func @transform_2(%arg0: i32, %arg1: i32, %arg2: i32) -> (i32, i32) {
    %c0_i32 = arith.constant 0 : i32
    %c0_i32_0 = arith.constant 0 : i32
    return %c0_i32, %arg1 : i32, i32
  }
  func.func @transform_3(%arg0: i32, %arg1: i32, %arg2: i32) -> (i32, i32) {
    %c0_i32 = arith.constant 0 : i32
    return %arg0, %arg1 : i32, i32
  }
}

</mosaic_0001>

<bundles_post_ra>
// kernel: tpu_custom_call.1
= control target key start
LH: loop header
LB: loop body
LE: loop exit
PB: predicated region body
PF: predicated region fallthrough
CT: control target
= control target key end

     0   :  { %v243_v1 = vmov 0.0   ;;  %vm244_vm0 = vmmov 0   ;;  %vm27_vm1 = vcmask 392192   ;;  %s314_s0 = inlined_call_operand.vmem [shape: bf16[16,128], index: 0, kind: input, shape index: {}]   ;;  %s315_s1 = inlined_call_operand.vmem [shape: bf16[128,48], index: 1, kind: input, shape index: {}]   ;;  %s316_s2 = inlined_call_operand.vmem [shape: f32[1,48], index: 2, kind: input, shape index: {}]   ;;  %s317_s3 = inlined_call_operand.hbm [shape: f32[16,48], index: 3, kind: output, shape index: {}]  }
   0x1   :  { %v210_v0 = vld [vmem:[%s315_s1] sm:$0xff]   ;;  %185 = vmatprep.subr.bf16.mxu0 %v243_v1  ;;  %v211_v2 = vld [vmem:[%s315_s1 + $0x8] sm:$0xff]   ;;  %201 = vmatprep.mubr.msk.bf16.mxu0 %vm244_vm0, %v243_v1  ;;  %v212_v3 = vld [vmem:[%s315_s1 + $0x10] sm:$0xff]  }
   0x2   :  { %186 = vmatpush3.bf16.msra.mxu0 %v210_v0  ;;  %v166_v4 = vld [vmem:[%s316_s2] ss:$0 sm:$0xff] }
   0x3   :  { %187 = vmatprep.subr.bf16.mxu0 %v243_v1 }
   0x6   :  { %188 = vmatpush3.bf16.msra.mxu0 %v211_v2 }
   0x7   :  { %189 = vmatprep.subr.bf16.mxu0 %v243_v1 }
   0x8   :  { %8 = vsyncpa [#allocation3], 0  ;;  %v213_v5 = vld [vmem:[%s315_s1 + $0x18] sm:$0xff]   ;;  %28 = vst.msk [vmem:[#allocation2] sm:$0xff] %vm27_vm1, %v166_v4  ;;  %v214_v6 = vld [vmem:[%s315_s1 + $0x20] sm:$0xff]   ;;  %s245_s4 = smov [#allocation2]  }
   0x9   :  { %29 = vst.msk [vmem:[#allocation2 + $0x8] sm:$0xff] %vm27_vm1, %v166_v4  ;;  %v215_v7 = vld [vmem:[%s315_s1 + $0x28] sm:$0xff]   ;;  %v216_v8 = vld [vmem:[%s315_s1 + $0x30] sm:$0xff]   ;;  %v217_v9 = vld [vmem:[%s315_s1 + $0x38] sm:$0xff]   ;;  %s155_s5 = sshll.u32 %s245_s4, 4  ;;  %s156_s5 = int_to_ptr.vmem [resolvable:$true] %s155_s5 }
   0xa   :  { %190 = vmatpush3.bf16.msra.mxu0 %v212_v3  ;;  %v218_v10 = vld [vmem:[%s314_s0] sm:$0xff]   ;;  %s219_s1 = scalar_lea.vmem %s156_s5, 256  ;;  %p224_p1 = scmp.lt.s32.totalorder %s156_s5, %s156_s5 }
   0xb   :  { %191 = vmatprep.subr.bf16.mxu0 %v243_v1  ;;  %p220_p0 = scmp.ne.s32.totalorder %s156_s5, %s219_s1  ;;  %p225_p2 = scmp.lt.s32.totalorder %s219_s1, %s219_s1 }
   0xd   :  { %p226_p3 = por %p225_p2, %p224_p1 }
   0xe   :  { %192 = vmatpush3.bf16.msra.mxu0 %v213_v5 }
   0xf   :  { %193 = vmatprep.subr.bf16.mxu0 %v243_v1  ;;  %v30_v11 = vld [vmem:[#allocation2] sm:$0xff]  ;;  %p227_p4 = pnand %p226_p3, %p220_p0 }
  0x10   :  { %v31_v13 = vld [vmem:[#allocation2 + $0x8] sm:$0xff] }
  0x12   :  { %194 = vmatpush3.bf16.msra.mxu0 %v214_v6 }
  0x13   :  { %195 = vmatprep.subr.bf16.mxu0 %v243_v1 }
  0x16   :  { %196 = vmatpush3.bf16.msra.mxu0 %v215_v7 }
  0x17   :  { %197 = vmatprep.subr.bf16.mxu0 %v243_v1 }
  0x1a   :  { %198 = vmatpush3.bf16.msra.mxu0 %v216_v8 }
  0x1b   :  { %199 = vmatprep.subr.bf16.mxu0 %v243_v1 }
  0x1e   :  { %200 = vmatpush3.bf16.msra.mxu0 %v217_v9 }
  0x21   :  { %202 = vmatmul.mubr.bf16.vlgmr.msra.gmra.mrb[0].mxu0 %v218_v10 }
  0xf4   :  { %v138_v12 = vpop.f32.mrb[0].mxu0 }
  0xf5   :  { %v145_v14 = vadd.f32 %v138_v12, %v30_v11  ;;  %v203_v15 = vpop.f32.mrb[1].mxu0 }
  0xf6   :  { %v141_v16 = vpop.f32.mrb[2].mxu0 }
  0xf7   :  { %148 = vst.msk [vmem:[#allocation2] sm:$0xff] %vm27_vm1, %v145_v14  ;;  %v146_v17 = vadd.f32 %v141_v16, %v31_v13  ;;  %v204_v18 = vpop.f32.mrb[3].mxu0 }
  0xf9   :  { %149 = vst.msk [vmem:[#allocation2 + $0x8] sm:$0xff] %vm27_vm1, %v146_v17 }
  0xfa   :  { %230 = shalt.err (!%p227_p4)
}
  0xfb   :  { %s231_s7 = scalar_lea.hbm %s317_s3, 256 }
  0xfc   :  { %p232_p5 = scmp.ne.s32.totalorder %s317_s3, %s231_s7  ;;  %p235_p6 = scmp.lt.u32.totalorder %s231_s7, %s317_s3 }
  0xfe   :  { %p237_p7 = pnand %p235_p6, %p232_p5 }
 0x100   :  { %240 = shalt.err (!%p237_p7)
}
 0x101   :  { %s246_s12 = smov 128   ;;  %s247_s13 = smov 8  }
 0x102   :  { %161 = dma.vmem_to_hbm [thread:$0]  %s156_s5, 256, %s317_s3, [#allocation3], %s246_s12, %s246_s12, %s247_s13  }
 0x103   :  { %241 = dma.done.wait [#allocation3], 256  }
 0x104   :  { %242 = vsyncadd [#allocation3], 4294967040 }
 0x105   :  { %165 = vsyncpa [#allocation3], 1 }

</bundles_post_ra>
